<compile_context>
chip_gen: v5e
topology: v5e:2x2
jax: 0.10.0
libtpu: 0.0.40
codegen_flags: <defaults>
</compile_context>

<pallas_src>
import math
import functools

import jax
import jax.numpy as jnp
from jax.experimental import pallas as pl
from jax.experimental.pallas import tpu as pltpu


def _round_up(x, m):
    return ((x + m - 1) // m) * m


def _cdiv(a, b):
    return -(-a // b)


def _pick_tile(dim, prefs):
    for t in prefs:
        if dim >= t and dim % t == 0:
            return t
    return dim  # single full-extent tile (allowed: block dim == array dim)


# ----------------------------------------------------------------------------------
# Fused matmul: out = act( (X @ W) * scale + bias [+ residual] )
# Fast path (single K tile): no scratch accumulator, grid (M_tiles, N_tiles).
# Slow path (K tiled): grid (M_tiles, N_tiles, K_tiles), K innermost / "arbitrary".
# X/W in bf16, f32 accumulate + epilogue, bf16 output.
# ----------------------------------------------------------------------------------
def _bn_epilogue(y, sb_ref, res, relu):
    y = y * sb_ref[0:1, :] + sb_ref[1:2, :]
    if res is not None:
        y = y + res.astype(jnp.float32)
    if relu:
        y = jnp.maximum(y, 0.0)
    return y


def _matmul_bn_kernel_k1(x_ref, w_ref, sb_ref, *rest, has_res, relu):
    if has_res:
        res_ref, o_ref = rest
        res = res_ref[...]
    else:
        (o_ref,) = rest
        res = None
    y = jnp.dot(x_ref[...], w_ref[...], preferred_element_type=jnp.float32)
    o_ref[...] = _bn_epilogue(y, sb_ref, res, relu).astype(o_ref.dtype)


def _matmul_bn_kernel(x_ref, w_ref, sb_ref, *rest, has_res, relu):
    if has_res:
        res_ref, o_ref, acc_ref = rest
    else:
        o_ref, acc_ref = rest

    k = pl.program_id(2)

    @pl.when(k == 0)
    def _():
        acc_ref[...] = jnp.zeros_like(acc_ref)

    acc_ref[...] += jnp.dot(x_ref[...], w_ref[...],
                            preferred_element_type=jnp.float32)

    @pl.when(k == pl.num_programs(2) - 1)
    def _():
        res = res_ref[...] if has_res else None
        o_ref[...] = _bn_epilogue(acc_ref[...], sb_ref, res,
                                  relu).astype(o_ref.dtype)


def fused_matmul_bn(x, w, scale, bias, residual=None, relu=True,
                    out_dtype=jnp.bfloat16):
    """x: (M, K), w: (K, N), scale/bias: (N,), residual: (M, N) or None."""
    M, K = x.shape
    _, N = w.shape

    tk = K if K <= 2048 else _pick_tile(K, (512, 256, 128))
    k_tiles = K // tk
    tn = _pick_tile(N, (512, 256, 128))
    padM = _round_up(M, 8)
    if padM > 512:
        tm = 512
        padM = _round_up(padM, tm)
    else:
        tm = padM

    x = x.astype(jnp.bfloat16)
    w = w.astype(jnp.bfloat16)
    if padM != M:
        x = jnp.pad(x, ((0, padM - M), (0, 0)))
    sb = jnp.stack([scale, bias]).astype(jnp.float32)            # (2, N)

    has_res = residual is not None
    if has_res:
        r = residual.astype(jnp.bfloat16)
        if padM != M:
            r = jnp.pad(r, ((0, padM - M), (0, 0)))

    flops = 2 * padM * K * N
    bytes_accessed = 2 * (padM * K + K * N + padM * N * (2 + int(has_res)))
    cost = pl.CostEstimate(flops=flops, transcendentals=0,
                           bytes_accessed=bytes_accessed)

    if k_tiles == 1:
        inputs = [x, w, sb]
        in_specs = [
            pl.BlockSpec((tm, K), lambda i, j: (i, 0)),
            pl.BlockSpec((K, tn), lambda i, j: (0, j)),
            pl.BlockSpec((2, tn), lambda i, j: (0, j)),
        ]
        if has_res:
            inputs.append(r)
            in_specs.append(pl.BlockSpec((tm, tn), lambda i, j: (i, j)))
        out = pl.pallas_call(
            functools.partial(_matmul_bn_kernel_k1, has_res=has_res, relu=relu),
            out_shape=jax.ShapeDtypeStruct((padM, N), out_dtype),
            grid_spec=pltpu.PrefetchScalarGridSpec(
                num_scalar_prefetch=0,
                grid=(padM // tm, N // tn),
                in_specs=in_specs,
                out_specs=pl.BlockSpec((tm, tn), lambda i, j: (i, j)),
            ),
            compiler_params=pltpu.CompilerParams(
                dimension_semantics=("parallel", "parallel")),
            cost_estimate=cost,
        )(*inputs)
    else:
        inputs = [x, w, sb]
        in_specs = [
            pl.BlockSpec((tm, tk), lambda i, j, k: (i, k)),
            pl.BlockSpec((tk, tn), lambda i, j, k: (k, j)),
            pl.BlockSpec((2, tn), lambda i, j, k: (0, j)),
        ]
        if has_res:
            inputs.append(r)
            in_specs.append(pl.BlockSpec((tm, tn), lambda i, j, k: (i, j)))
        out = pl.pallas_call(
            functools.partial(_matmul_bn_kernel, has_res=has_res, relu=relu),
            out_shape=jax.ShapeDtypeStruct((padM, N), out_dtype),
            grid_spec=pltpu.PrefetchScalarGridSpec(
                num_scalar_prefetch=0,
                grid=(padM // tm, N // tn, k_tiles),
                in_specs=in_specs,
                out_specs=pl.BlockSpec((tm, tn), lambda i, j, k: (i, j)),
                scratch_shapes=[pltpu.VMEM((tm, tn), jnp.float32)],
            ),
            compiler_params=pltpu.CompilerParams(
                dimension_semantics=("parallel", "parallel", "arbitrary")),
            cost_estimate=cost,
        )(*inputs)
    return out[:M] if padM != M else out


# ----------------------------------------------------------------------------------
# Conv2d + BN (+ residual) (+ ReLU) via im2col + fused matmul kernel.
# Used for the 7x7/s2 stem, stride-2 3x3 convs, 1x1 downsample convs and the tiny
# (H*W < 16) stride-1 convs where batch is folded into the row axis.
# TODO(synk): strided convs still build im2col patches with XLA slices/concat.
# ----------------------------------------------------------------------------------
def conv2d_bn_matmul(x, w, scale, bias, stride=1, padding=0, relu=True,
                     residual=None):
    N, H, W, C = x.shape
    kh, kw, _, Cout = w.shape
    Hout = (H + 2 * padding - kh) // stride + 1
    Wout = (W + 2 * padding - kw) // stride + 1

    xp = jnp.pad(x, ((0, 0), (padding, padding), (padding, padding), (0, 0)))
    if kh == 1 and kw == 1:
        patches = xp[:, ::stride, ::stride, :][:, :Hout, :Wout, :]
    else:
        cols = []
        for i in range(kh):
            for j in range(kw):
                cols.append(xp[:, i:i + (Hout - 1) * stride + 1:stride,
                                  j:j + (Wout - 1) * stride + 1:stride, :])
        patches = jnp.concatenate(cols, axis=-1)

    x2d = patches.reshape(N * Hout * Wout, kh * kw * C)
    w2d = w.reshape(kh * kw * C, Cout)
    res2d = (residual.reshape(N * Hout * Wout, Cout)
             if residual is not None else None)
    out2d = fused_matmul_bn(x2d, w2d, scale, bias, residual=res2d, relu=relu)
    return out2d.reshape(N, Hout, Wout, Cout)


# ----------------------------------------------------------------------------------
# Direct stride-1 3x3 conv + BN (+ residual) (+ ReLU) in the padded-flat layout.
# Input is the zero-ring padded image flattened to (N, Lpad, Cin) with `lead` extra
# zero rows at the front; the kernel gets the whole image as one resident block and
# slices each tap window with pl.ds -> no HBM duplication.  Grid = (Cout tiles,
# batch, row tiles) so weights are fetched once per channel tile.
# Output row q in [0, Lout) corresponds to padded-flat position q (ring rows are
# junk unless mask_ring=True zeroes them for chaining).
# ----------------------------------------------------------------------------------
def _direct_conv_kernel(x_ref, w_ref, sb_ref, *rest, wp, hp, p, tm, lead,
                        mask_ring, has_res, relu, single_tile):
    if has_res:
        res_ref, o_ref = rest
    else:
        (o_ref,) = rest
    kh, kw = w_ref.shape[0], w_ref.shape[1]

    if single_tile:
        base = 0
    else:
        base = pl.multiple_of(pl.program_id(2) * tm, 8)

    acc = None
    for i in range(kh):
        for j in range(kw):
            lhs = x_ref[0, pl.ds(base + i * wp + j, tm), :]       # (tm, Cin) bf16
            d = jnp.dot(lhs, w_ref[i, j], preferred_element_type=jnp.float32)
            acc = d if acc is None else acc + d

    y = acc * sb_ref[0:1, :] + sb_ref[1:2, :]
    if has_res:
        y = y + res_ref[0, pl.ds(base + lead, tm), :].astype(jnp.float32)
    if relu:
        y = jnp.maximum(y, 0.0)
    if mask_ring:
        q = base + jax.lax.broadcasted_iota(jnp.int32, (tm, 1), 0)
        row = q // wp
        col = q - row * wp
        interior = ((row >= p) & (row < hp - p) & (col >= p) & (col < wp - p))
        y = jnp.where(interior, y, 0.0)
    o_ref[0] = y.astype(o_ref.dtype)


def _flat_conv_prep(x_nhwc, p=1, tm_max=256):
    """Zero-ring pad, flatten and extend x so the windowed kernels can run."""
    N, H, W, C = x_nhwc.shape
    Hp, Wp = H + 2 * p, W + 2 * p
    L = Hp * Wp
    lead = p * Wp + p
    tm = min(tm_max, _round_up(L, 8))
    n_ft = _cdiv(L, tm)
    Lout = n_ft * tm
    Lpad = Lout + 2 * lead
    xb = x_nhwc.astype(jnp.bfloat16)
    x_flat = jnp.pad(xb, ((0, 0), (p, p), (p, p), (0, 0))).reshape(N, L, C)
    x_ext = jnp.pad(x_flat, ((0, 0), (lead, Lpad - L - lead), (0, 0)))
    meta = dict(N=N, H=H, W=W, Hp=Hp, Wp=Wp, L=L, lead=lead, tm=tm,
                n_ft=n_ft, Lout=Lout, Lpad=Lpad, p=p)
    return x_ext, meta


def flat_to_nhwc(y_flat, meta):
    N, Hp, Wp, p = meta['N'], meta['Hp'], meta['Wp'], meta['p']
    H, W, L = meta['H'], meta['W'], meta['L']
    C = y_flat.shape[-1]
    y = y_flat[:, :L, :].reshape(N, Hp, Wp, C)
    return y[:, p:p + H, p:p + W, :]


def direct_conv_flat(x_ext, meta, w, scale, bias, *, relu=True,
                     mask_ring=False, res_ext=None):
    """x_ext: (N, Lpad, Cin); res_ext: (N, Lpad, Cout) or None. -> (N, Lout, Cout)."""
    N, Lpad, Lout = meta['N'], meta['Lpad'], meta['Lout']
    tm, n_ft = meta['tm'], meta['n_ft']
    Wp, Hp, lead, p = meta['Wp'], meta['Hp'], meta['lead'], meta['p']
    kh, kw, Cin, Cout = w.shape
    tcout = Cout if Cout <= 256 else 256
    assert Cout % tcout == 0
    c_tiles = Cout // tcout

    wb = w.astype(jnp.bfloat16)
    sb = jnp.stack([scale, bias]).astype(jnp.float32)            # (2, Cout)

    has_res = res_ext is not None
    inputs = [x_ext.astype(jnp.bfloat16), wb, sb]
    in_specs = [
        pl.BlockSpec((1, Lpad, Cin), lambda c, n, t: (n, 0, 0)),
        pl.BlockSpec((kh, kw, Cin, tcout), lambda c, n, t: (0, 0, 0, c)),
        pl.BlockSpec((2, tcout), lambda c, n, t: (0, c)),
    ]
    if has_res:
        inputs.append(res_ext.astype(jnp.bfloat16))
        in_specs.append(pl.BlockSpec((1, Lpad, tcout), lambda c, n, t: (n, 0, c)))

    flops = 2 * N * Lout * kh * kw * Cin * Cout
    bytes_accessed = 2 * (x_ext.size + wb.size
                          + N * Lout * Cout * (1 + int(has_res)))

    out = pl.pallas_call(
        functools.partial(_direct_conv_kernel, wp=Wp, hp=Hp, p=p, tm=tm,
                          lead=lead, mask_ring=mask_ring, has_res=has_res,
                          relu=relu, single_tile=(n_ft == 1)),
        out_shape=jax.ShapeDtypeStruct((N, Lout, Cout), jnp.bfloat16),
        grid_spec=pltpu.PrefetchScalarGridSpec(
            num_scalar_prefetch=0,
            grid=(c_tiles, N, n_ft),
            in_specs=in_specs,
            out_specs=pl.BlockSpec((1, tm, tcout), lambda c, n, t: (n, t, c)),
        ),
        compiler_params=pltpu.CompilerParams(
            dimension_semantics=("parallel", "parallel", "parallel")),
        cost_estimate=pl.CostEstimate(flops=flops, transcendentals=0,
                                      bytes_accessed=bytes_accessed),
    )(*inputs)
    return out


# ----------------------------------------------------------------------------------
# MaxPool2d (kernel=3, stride=2, padding=1): the padded stem output is read ONCE by a
# flat shifted-window kernel that computes the full-resolution 3x3 "same" max; the
# stride-2 subsample is a cheap XLA view.  Zero padding is valid because the stem
# output is post-ReLU (all values >= 0).
# ----------------------------------------------------------------------------------
def _max3x3_kernel(x_ref, o_ref, *, wp, tm, single_tile):
    base = 0 if single_tile else pl.multiple_of(pl.program_id(1) * tm, 8)
    m = None
    for i in range(3):
        for j in range(3):
            v = x_ref[0, pl.ds(base + i * wp + j, tm), :]
            m = v if m is None else jnp.maximum(m, v)
    o_ref[0] = m


def maxpool2d_3x3_s2(x):
    N, H, W, C = x.shape
    p = 1
    Hout = (H + 2 * p - 3) // 2 + 1
    Wout = (W + 2 * p - 3) // 2 + 1
    x_ext, meta = _flat_conv_prep(x, p=p, tm_max=512)

    out_flat = pl.pallas_call(
        functools.partial(_max3x3_kernel, wp=meta['Wp'], tm=meta['tm'],
                          single_tile=(meta['n_ft'] == 1)),
        out_shape=jax.ShapeDtypeStruct((N, meta['Lout'], C), jnp.bfloat16),
        grid_spec=pltpu.PrefetchScalarGridSpec(
            num_scalar_prefetch=0,
            grid=(N, meta['n_ft']),
            in_specs=[pl.BlockSpec((1, meta['Lpad'], C), lambda n, t: (n, 0, 0))],
            out_specs=pl.BlockSpec((1, meta['tm'], C), lambda n, t: (n, t, 0)),
        ),
        compiler_params=pltpu.CompilerParams(
            dimension_semantics=("parallel", "parallel")),
    )(x_ext)

    full = flat_to_nhwc(out_flat, meta)                    # full-res 3x3 max, (N,H,W,C)
    return full[:, :2 * Hout:2, :2 * Wout:2, :]            # stride-2 subsample


# ----------------------------------------------------------------------------------
# Fused global average pool ('avg') + Linear classifier in one Pallas kernel.
# ----------------------------------------------------------------------------------
def _gap_fc_kernel(x_ref, w_ref, b_ref, o_ref):
    feat = jnp.mean(x_ref[...].astype(jnp.float32), axis=1)        # (Np, C)
    o_ref[...] = jnp.dot(feat, w_ref[...],
                         preferred_element_type=jnp.float32) + b_ref[...]


def global_pool_fc(x, fc_w, fc_b):
    N, H, W, C = x.shape
    ncls = fc_w.shape[1]
    padcls = max(128, _round_up(ncls, 128))          # lane-dense classifier output

    x3 = x.reshape(N, H * W, C).astype(jnp.bfloat16)
    Np = max(8, _round_up(N, 8))
    if Np != N:
        x3 = jnp.pad(x3, ((0, Np - N), (0, 0), (0, 0)))
    wpad = jnp.pad(fc_w.astype(jnp.float32), ((0, 0), (0, padcls - ncls)))
    bpad = jnp.pad(fc_b.astype(jnp.float32), ((0, padcls - ncls))).reshape(1, padcls)

    out = pl.pallas_call(
        _gap_fc_kernel,
        out_shape=jax.ShapeDtypeStruct((Np, padcls), jnp.float32),
        grid_spec=pltpu.PrefetchScalarGridSpec(
            num_scalar_prefetch=0,
            grid=(1,),
            in_specs=[pl.BlockSpec((Np, H * W, C), lambda i: (0, 0, 0)),
                      pl.BlockSpec((C, padcls), lambda i: (0, 0)),
                      pl.BlockSpec((1, padcls), lambda i: (0, 0))],
            out_specs=pl.BlockSpec((Np, padcls), lambda i: (0, 0)),
        ),
    )(x3, wpad, bpad)
    return out[:N, :ncls]


# ----------------------------------------------------------------------------------
# BasicBlock forward with dispatch:
#  * stride-1, no downsample, H*W >= 16: fully fused padded-flat direct path
#    (conv1 ring-masked, conv2 reads the flat activation and adds the identity
#     in-kernel; only one pad at entry and one unpad at exit).
#  * otherwise: im2col matmul path (residual fused into conv2's epilogue), with the
#    second conv going direct when the spatial size is large enough.
# ----------------------------------------------------------------------------------
DIRECT_MIN_PIX = 16


def basic_block_forward(x, blk):
    N = x.shape[0]
    H, W = x.shape[1], x.shape[2]
    stride = blk['stride']
    s1, b1 = blk['bn1']
    s2, b2 = blk['bn2']

    if stride == 1 and 'down_conv' not in blk and H * W >= DIRECT_MIN_PIX:
        x_ext, meta = _flat_conv_prep(x, p=1)
        h = direct_conv_flat(x_ext, meta, blk['conv1'], s1, b1,
                             relu=True, mask_ring=True)
        h_ext = jnp.pad(h, ((0, 0),
                            (meta['lead'], meta['Lpad'] - meta['Lout'] - meta['lead']),
                            (0, 0)))
        y = direct_conv_flat(h_ext, meta, blk['conv2'], s2, b2,
                             relu=True, mask_ring=False, res_ext=x_ext)
        return flat_to_nhwc(y, meta)

    # conv1 (strided or tiny) -> bn1 -> relu via im2col matmul
    h = conv2d_bn_matmul(x, blk['conv1'], s1, b1, stride=stride, padding=1,
                         relu=True)
    if 'down_conv' in blk:
        ds, db = blk['down_bn']
        identity = conv2d_bn_matmul(x, blk['down_conv'], ds, db, stride=stride,
                                    padding=0, relu=False)
    else:
        identity = x

    Hh, Wh = h.shape[1], h.shape[2]
    if Hh * Wh >= DIRECT_MIN_PIX:
        h_ext, meta = _flat_conv_prep(h, p=1)
        Cout = blk['conv2'].shape[-1]
        rflat = jnp.pad(identity.astype(jnp.bfloat16),
                        ((0, 0), (1, 1), (1, 1), (0, 0))).reshape(N, meta['L'], Cout)
        r_ext = jnp.pad(rflat, ((0, 0),
                                (meta['lead'], meta['Lpad'] - meta['L'] - meta['lead']),
                                (0, 0)))
        y = direct_conv_flat(h_ext, meta, blk['conv2'], s2, b2,
                             relu=True, mask_ring=False, res_ext=r_ext)
        return flat_to_nhwc(y, meta)

    return conv2d_bn_matmul(h, blk['conv2'], s2, b2, stride=1, padding=1,
                            relu=True, residual=identity)


# ----------------------------------------------------------------------------------
# Parameter init (deterministic, synthetic) and the ResNet forward
# ----------------------------------------------------------------------------------
def _conv_w(key, kh, kw, cin, cout):
    std = math.sqrt(2.0 / (kh * kw * cout))          # kaiming_normal_(fan_out, relu)
    return std * jax.random.normal(key, (kh, kw, cin, cout), jnp.float32)


def _bn_params(c, eps=1e-5):
    gamma = jnp.ones((c,), jnp.float32)
    beta = jnp.zeros((c,), jnp.float32)
    running_mean = jnp.zeros((c,), jnp.float32)
    running_var = jnp.ones((c,), jnp.float32)
    scale = gamma / jnp.sqrt(running_var + eps)
    bias = beta - running_mean * scale
    return scale, bias


def init_resnet_params(key, layers=(1, 1, 1, 1), in_chans=3, num_classes=10):
    keys = iter(jax.random.split(key, 128))
    params = {}
    params['conv1'] = _conv_w(next(keys), 7, 7, in_chans, 64)
    params['bn1'] = _bn_params(64)

    inplanes = 64
    channels = [64, 128, 256, 512]
    strides = [1, 2, 2, 2]
    for li, (planes, nblocks, stride) in enumerate(zip(channels, layers, strides)):
        blocks = []
        for bi in range(nblocks):
            s = stride if bi == 0 else 1
            blk = {
                'stride': s,
                'conv1': _conv_w(next(keys), 3, 3, inplanes, planes),
                'bn1': _bn_params(planes),
                'conv2': _conv_w(next(keys), 3, 3, planes, planes),
                'bn2': _bn_params(planes),
            }
            if s != 1 or inplanes != planes:     # downsample_conv: 1x1, stride s
                blk['down_conv'] = _conv_w(next(keys), 1, 1, inplanes, planes)
                blk['down_bn'] = _bn_params(planes)
            blocks.append(blk)
            inplanes = planes
        params[f'layer{li + 1}'] = blocks

    params['fc_w'] = 0.01 * jax.random.normal(next(keys), (512, num_classes),
                                              jnp.float32)
    params['fc_b'] = jnp.zeros((num_classes,), jnp.float32)
    return params


def resnet_forward(params, x_nchw):
    # NCHW (PyTorch convention) -> NHWC, bf16 activations
    x = jnp.transpose(x_nchw, (0, 2, 3, 1)).astype(jnp.bfloat16)

    # stem: conv7x7/s2 -> bn1 -> relu (fused), then maxpool 3x3/s2
    s, b = params['bn1']
    x = conv2d_bn_matmul(x, params['conv1'], s, b, stride=2, padding=3, relu=True)
    x = maxpool2d_3x3_s2(x)

    # layers 1..4 : BasicBlock (expansion=1)
    for li in range(1, 5):
        for blk in params[f'layer{li}']:
            x = basic_block_forward(x, blk)

    # global avg pool + flatten + fc, fused in one kernel
    # TODO(synk): drop_rate defaults to 0.0 so F.dropout is a no-op; not implemented.
    return global_pool_fc(x, params['fc_w'], params['fc_b'])


if __name__ == "__main__":
    key = jax.random.PRNGKey(0)
    pkey, xkey = jax.random.split(key)
    params = init_resnet_params(pkey, layers=(1, 1, 1, 1), in_chans=3,
                                num_classes=10)
    x = jax.random.normal(xkey, (2, 3, 16, 16), jnp.float32)   # NCHW input
    out = resnet_forward(params, x)
    jax.block_until_ready(out)
    assert out.shape == (2, 10) and out.dtype == jnp.float32
    print("KERNEL_OK")
</pallas_src>

<mosaic_0001>
module attributes {stable_mosaic.version = 11 : i64} {
  func.func @_matmul_bn_kernel_k1(%arg0: i32, %arg1: i32, %arg2: memref<128x147xbf16, #tpu.memory_space<vmem>>, %arg3: memref<147x64xbf16, #tpu.memory_space<vmem>>, %arg4: memref<2x64xf32, #tpu.memory_space<vmem>>, %arg5: memref<128x64xbf16, #tpu.memory_space<vmem>>) attributes {dimension_semantics = [#tpu.dimension_semantics<parallel>, #tpu.dimension_semantics<parallel>], iteration_bounds = array<i64: 1, 1>, scalar_prefetch = 0 : i64, scratch_operands = 0 : i64, tpu.core_type = #tpu.core_type<tc>, window_params = [{transform_indices = @transform_0, window_bounds = array<i64: 128, 147>}, {transform_indices = @transform_1, window_bounds = array<i64: 147, 64>}, {transform_indices = @transform_2, window_bounds = array<i64: 2, 64>}, {transform_indices = @transform_3, window_bounds = array<i64: 128, 64>}]} {
    %c0 = arith.constant 0 : index
    %c0_0 = arith.constant 0 : index
    %0 = vector.load %arg2[%c0, %c0_0] : memref<128x147xbf16, #tpu.memory_space<vmem>>, vector<128x147xbf16>
    %c0_1 = arith.constant 0 : index
    %c0_2 = arith.constant 0 : index
    %1 = vector.load %arg3[%c0_1, %c0_2] : memref<147x64xbf16, #tpu.memory_space<vmem>>, vector<147x64xbf16>
    %cst = arith.constant dense<0.000000e+00> : vector<128x64xf32>
    %2 = tpu.matmul %0, %1, %cst {dimension_numbers = #tpu.dot_dimension_numbers<[1], [0], [0], [1], [0, 0, 1, 1], [], []>} : vector<128x147xbf16>, vector<147x64xbf16>, vector<128x64xf32> -> vector<128x64xf32>
    %c0_3 = arith.constant 0 : index
    %c0_4 = arith.constant 0 : index
    %3 = vector.load %arg4[%c0_3, %c0_4] : memref<2x64xf32, #tpu.memory_space<vmem>>, vector<1x64xf32>
    %4 = vector.broadcast %3 : vector<1x64xf32> to vector<128x64xf32>
    %5 = arith.mulf %2, %4 : vector<128x64xf32>
    %c1 = arith.constant 1 : index
    %c0_5 = arith.constant 0 : index
    %6 = vector.load %arg4[%c1, %c0_5] : memref<2x64xf32, #tpu.memory_space<vmem>>, vector<1x64xf32>
    %7 = vector.broadcast %6 : vector<1x64xf32> to vector<128x64xf32>
    %8 = arith.addf %5, %7 : vector<128x64xf32>
    %cst_6 = arith.constant 0.000000e+00 : f32
    %9 = vector.broadcast %cst_6 : f32 to vector<128x64xf32>
    %10 = arith.maximumf %8, %9 : vector<128x64xf32>
    %11 = arith.truncf %10 : vector<128x64xf32> to vector<128x64xbf16>
    %c0_7 = arith.constant 0 : index
    %c0_8 = arith.constant 0 : index
    %12 = vector.load %arg5[%c0_7, %c0_8] : memref<128x64xbf16, #tpu.memory_space<vmem>>, vector<128x64xbf16>
    tpu.vector_store %arg5[%c0_7, %c0_8], %11 {strides = array<i32>} : memref<128x64xbf16, #tpu.memory_space<vmem>>, vector<128x64xbf16>,
    return
  }
  func.func @transform_0(%arg0: i32, %arg1: i32) -> (i32, i32) {
    %c0_i32 = arith.constant 0 : i32
    %c0_i32_0 = arith.constant 0 : i32
    return %arg0, %c0_i32 : i32, i32
  }
  func.func @transform_1(%arg0: i32, %arg1: i32) -> (i32, i32) {
    %c0_i32 = arith.constant 0 : i32
    %c0_i32_0 = arith.constant 0 : i32
    return %c0_i32, %arg1 : i32, i32
  }
  func.func @transform_2(%arg0: i32, %arg1: i32) -> (i32, i32) {
    %c0_i32 = arith.constant 0 : i32
    %c0_i32_0 = arith.constant 0 : i32
    return %c0_i32, %arg1 : i32, i32
  }
  func.func @transform_3(%arg0: i32, %arg1: i32) -> (i32, i32) {
    %c0_i32 = arith.constant 0 : i32
    return %arg0, %arg1 : i32, i32
  }
}

</mosaic_0001>

<bundles_post_ra>
// kernel: tpu_custom_call.1
= control target key start
LH: loop header
LB: loop body
LE: loop exit
PB: predicated region body
PF: predicated region fallthrough
CT: control target
= control target key end

     0   :  { %vm204_vm0 = vcmask 1040384   ;;  %vm205_vm1 = vcmask 1041408   ;;  %v544_v2 = vmov 65535   ;;  %vm179_vm2 = vcmask 154624   ;;  %s811_s1 = inlined_call_operand.vmem [shape: bf16[147,64], index: 1, kind: input, shape index: {}]   ;;  %s812_s0 = inlined_call_operand.vmem [shape: bf16[128,147], index: 0, kind: input, shape index: {}]   ;;  %s813_s2 = inlined_call_operand.vmem [shape: f32[2,64], index: 2, kind: input, shape index: {}]   ;;  %s814_s3 = inlined_call_operand.vmem [shape: bf16[128,64], index: 3, kind: output, shape index: {}]  }
   0x1   :  { %v529_v0 = vld [vmem:[%s811_s1 + $0x38] sm:$0xff]  ;;  %v49_v1 = vld [vmem:[%s811_s1 + $0x48] sm:$0x3]  ;;  %v206_v3 = vsel %vm204_vm0, 4294967295, %v544_v2  ;;  %v528_v5 = vld [vmem:[%s811_s1 + $0x30] sm:$0xff]  ;;  %vm377_vm3 = vcmask 519168  }
   0x2   :  { %v159_v4 = vunpack.c.l.b16 %v49_v1  ;;  %211 = vmatpush.bf16.msra.mxu0 %v529_v0  ;;  %531 = vmatpush.bf16.msra.mxu2 %v529_v0  ;;  %v207_v6 = vsel %vm205_vm1, %v206_v3, 0  ;;  %v527_v9 = vld [vmem:[%s811_s1 + $0x28] sm:$0xff]  ;;  %v530_v10 = vld [vmem:[%s811_s1 + $0x40] sm:$0xff]  ;;  %v516_v13 = vld [vmem:[%s812_s0 + $0x54] sm:$0xf] }
   0x3   :  { %v506_v11 = vld [vmem:[%s812_s0 + $0x4] sm:$0xf]  ;;  %v402_v12 = vld [vmem:[%s812_s0 + $0x8] sm:$0xf0]  ;;  %v442_v14 = vld [vmem:[%s812_s0 + $0x58] sm:$0xf0] }
   0x4   :  { %v169_v7 = vpack.c.b16 %v159_v4, %v159_v4  ;;  %v405_v15 = vor.u32 %v506_v11, %v402_v12  ;;  %v526_v16 = vld [vmem:[%s811_s1 + $0x20] sm:$0xff]  ;;  %v445_v17 = vor.u32 %v516_v13, %v442_v14  ;;  %v525_v18 = vld [vmem:[%s811_s1 + $0x18] sm:$0xff]  ;;  %v524_v19 = vld [vmem:[%s811_s1 + $0x10] sm:$0xff] }
   0x5   :  { %v523_v20 = vld [vmem:[%s811_s1 + $0x8] sm:$0xff]  ;;  %v508_v21 = vld [vmem:[%s812_s0 + $0x14] sm:$0xf]  ;;  %v410_v22 = vld [vmem:[%s812_s0 + $0x18] sm:$0xf0] }
   0x6   :  { %v209_v8 = vand.u32 %v207_v6, %v169_v7  ;;  %212 = vmatpush.bf16.msra.mxu0 %v528_v5  ;;  %532 = vmatpush.bf16.msra.mxu2 %v528_v5  ;;  %v518_v23 = vld [vmem:[%s812_s0 + $0x64] sm:$0xf]  ;;  %v450_v24 = vld [vmem:[%s812_s0 + $0x68] sm:$0xf0]  ;;  %v413_v25 = vor.u32 %v508_v21, %v410_v22  ;;  %v400_v27 = vld [vmem:[%s812_s0] sm:$0xf] }
   0x7   :  { %v522_v26 = vld [vmem:[%s811_s1] sm:$0xff]  ;;  %v507_v28 = vld [vmem:[%s812_s0 + $0x4] sm:$0xf0]  ;;  %v453_v31 = vor.u32 %v518_v23, %v450_v24  ;;  %v418_v35 = vld [vmem:[%s812_s0 + $0x28] sm:$0xf0] }
   0x8   :  { %266 = vmatpush.bf16.msra.mxu1 %v209_v8  ;;  %539 = vmatpush.bf16.msra.mxu3 %v209_v8  ;;  %v432_v29 = vld [vmem:[%s812_s0 + $0x40] sm:$0xf]  ;;  %v515_v30 = vld [vmem:[%s812_s0 + $0x44] sm:$0xf0]  ;;  %v401_v32 = vor.u32 %v507_v28, %v400_v27  ;;  %v510_v34 = vld [vmem:[%s812_s0 + $0x24] sm:$0xf] }
   0x9   :  { %v433_v33 = vor.u32 %v515_v30, %v432_v29  ;;  %v520_v36 = vld [vmem:[%s812_s0 + $0x74] sm:$0xf]  ;;  %v458_v37 = vld [vmem:[%s812_s0 + $0x78] sm:$0xf0]  ;;  %v421_v38 = vor.u32 %v510_v34, %v418_v35  ;;  %v408_v39 = vld [vmem:[%s812_s0 + $0x10] sm:$0xf] }
   0xa   :  { %213 = vmatpush.bf16.msra.mxu0 %v527_v9  ;;  %533 = vmatpush.bf16.msra.mxu2 %v527_v9  ;;  %v509_v40 = vld [vmem:[%s812_s0 + $0x14] sm:$0xf0]  ;;  %v440_v41 = vld [vmem:[%s812_s0 + $0x50] sm:$0xf]  ;;  %v461_v43 = vor.u32 %v520_v36, %v458_v37  ;;  %v512_v46 = vld [vmem:[%s812_s0 + $0x34] sm:$0xf] }
   0xb   :  { %v517_v42 = vld [vmem:[%s812_s0 + $0x54] sm:$0xf0]  ;;  %v409_v44 = vor.u32 %v509_v40, %v408_v39  ;;  %v426_v47 = vld [vmem:[%s812_s0 + $0x38] sm:$0xf0]  ;;  %v416_v49 = vld [vmem:[%s812_s0 + $0x20] sm:$0xf] }
   0xc   :  { %267 = vmatpush.bf16.msra.mxu1 %v530_v10  ;;  %540 = vmatpush.bf16.msra.mxu3 %v530_v10  ;;  %v441_v45 = vor.u32 %v517_v42, %v440_v41  ;;  %v429_v48 = vor.u32 %v512_v46, %v426_v47  ;;  %v511_v50 = vld [vmem:[%s812_s0 + $0x24] sm:$0xf0]  ;;  %v448_v51 = vld [vmem:[%s812_s0 + $0x60] sm:$0xf]  ;;  %v514_v55 = vld [vmem:[%s812_s0 + $0x44] sm:$0xf] }
   0xd   :  { %v519_v52 = vld [vmem:[%s812_s0 + $0x64] sm:$0xf0]  ;;  %v417_v53 = vor.u32 %v511_v50, %v416_v49  ;;  %v434_v56 = vld [vmem:[%s812_s0 + $0x48] sm:$0xf0]  ;;  %v424_v58 = vld [vmem:[%s812_s0 + $0x30] sm:$0xf] }
   0xe   :  { %214 = vmatpush.bf16.msra.mxu0 %v526_v16  ;;  %534 = vmatpush.bf16.msra.mxu2 %v526_v16  ;;  %v449_v54 = vor.u32 %v519_v52, %v448_v51  ;;  %v437_v57 = vor.u32 %v514_v55, %v434_v56  ;;  %v513_v59 = vld [vmem:[%s812_s0 + $0x34] sm:$0xf0]  ;;  %v456_v60 = vld [vmem:[%s812_s0 + $0x70] sm:$0xf]  ;;  %v702_v3 = vld [vmem:[%s813_s2] ss:$0 sm:$0xff] }
   0xf   :  { %498 = vmatmul.msk.bf16.vlgmr.msra.gmra.mxu1 %vm179_vm2, %v405_v15  ;;  %503 = vmatmul.msk.bf16.vlgmr.msra.gmra.mxu3 %vm179_vm2, %v445_v17  ;;  %v521_v61 = vld [vmem:[%s812_s0 + $0x74] sm:$0xf0]  ;;  %v425_v62 = vor.u32 %v513_v59, %v424_v58  ;;  %v707_v6 = vld [vmem:[%s813_s2 + $0x1] ss:$0 sm:$0xff] }
  0x10   :  { %v457_v63 = vor.u32 %v521_v61, %v456_v60 }
  0x12   :  { %215 = vmatpush.bf16.msra.mxu0 %v525_v18  ;;  %535 = vmatpush.bf16.msra.mxu2 %v525_v18 }
  0x16   :  { %216 = vmatpush.bf16.msra.mxu0 %v524_v19  ;;  %536 = vmatpush.bf16.msra.mxu2 %v524_v19 }
  0x1a   :  { %217 = vmatpush.bf16.msra.mxu0 %v523_v20  ;;  %537 = vmatpush.bf16.msra.mxu2 %v523_v20 }
  0x1e   :  { %218 = vmatpush.bf16.msra.mxu0 %v522_v26  ;;  %538 = vmatpush.bf16.msra.mxu2 %v522_v26 }
  0x1f   :  { %499 = vmatmul.msk.bf16.gmra.mxu1 %vm179_vm2, %v413_v25  ;;  %504 = vmatmul.msk.bf16.gmra.mxu3 %vm179_vm2, %v453_v31 }
  0x21   :  { %219 = vmatmul.bf16.vlgmr.msra.gmra.mxu0 %v401_v32  ;;  %239 = vmatmul.bf16.vlgmr.msra.gmra.mxu2 %v433_v33 }
  0x2f   :  { %500 = vmatmul.msk.bf16.gmra.mxu1 %vm179_vm2, %v421_v38  ;;  %505 = vmatmul.msk.bf16.gmra.mxu3 %vm179_vm2, %v461_v43 }
  0x31   :  { %224 = vmatmul.bf16.gmra.mxu0 %v409_v44  ;;  %244 = vmatmul.bf16.gmra.mxu2 %v441_v45 }
  0x3f   :  { %501 = vmatmul.msk.bf16.gmra.mxu1 %vm179_vm2, %v429_v48 }
  0x41   :  { %229 = vmatmul.bf16.gmra.mxu0 %v417_v53  ;;  %249 = vmatmul.bf16.gmra.mxu2 %v449_v54 }
  0x4f   :  { %502 = vmatmul.msk.bf16.gmra.mxu1 %vm179_vm2, %v437_v57 }
  0x51   :  { %234 = vmatmul.bf16.gmra.mxu0 %v425_v62  ;;  %254 = vmatmul.bf16.gmra.mxu2 %v457_v63 }
  0x8c   :  { %v269_v0 = vpop.f32.mrf.mxu1 }
  0x92   :  { %v294_v18 = vpop.f32.mrf.mxu3 }
  0x94   :  { %v271_v1 = vpop.f32.mrf.mxu1 }
  0x9a   :  { %v296_v29 = vpop.f32.mrf.mxu3 }
  0x9c   :  { %v274_v2 = vpop.f32.mrf.mxu1 }
  0x9e   :  { %v220_v4 = vpop.f32.mrf.mxu0 }
  0x9f   :  { %v270_v5 = vadd.f32 %v269_v0, %v220_v4 }
  0xa1   :  { %v311_v7 = vmul.f32 %v702_v3, %v270_v5 }
  0xa2   :  { %v299_v46 = vpop.f32.mrf.mxu3 }
  0xa3   :  { %v329_v8 = vadd.f32 %v707_v6, %v311_v7 }
  0xa4   :  { %v276_v9 = vpop.f32.mrf.mxu1  ;;  %v711_v11 = vpop.f32.mrf.mxu2 }
  0xa5   :  { %v345_v10 = vmax.f32 %v329_v8, 0.0 }
  0xa6   :  { %v222_v12 = vpop.f32.mrf.mxu0 }
  0xa7   :  { %v361_v13 = vpack.c.bf16 %v345_v10, %v345_v10  ;;  %v272_v14 = vadd.f32 %v271_v1, %v222_v12 }
  0xa9   :  { %378 = vst.msk [vmem:[%s814_s3] sm:$0xf] %vm377_vm3, %v361_v13  ;;  %v312_v15 = vmul.f32 %v702_v3, %v272_v14 }
  0xaa   :  { %v301_v62 = vpop.f32.mrf.mxu3 }
  0xab   :  { %v330_v16 = vadd.f32 %v707_v6, %v312_v15 }
  0xac   :  { %v279_v17 = vpop.f32.mrf.mxu1  ;;  %v719_v20 = vpop.f32.mrf.mxu2 }
  0xad   :  { %v346_v19 = vmax.f32 %v330_v16, 0.0 }
  0xae   :  { %v225_v21 = vpop.f32.mrf.mxu0 }
  0xaf   :  { %v362_v22 = vpack.c.bf16 %v346_v19, %v346_v19  ;;  %v275_v23 = vadd.f32 %v274_v2, %v225_v21 }
  0xb1   :  { %379 = vst.msk [vmem:[%s814_s3 + $0x4] sm:$0xf] %vm377_vm3, %v362_v22  ;;  %v313_v24 = vmul.f32 %v702_v3, %v275_v23 }
  0xb2   :  { %v304_v21 = vpop.f32.mrf.mxu3 }
  0xb3   :  { %v331_v25 = vadd.f32 %v707_v6, %v313_v24 }
  0xb4   :  { %v281_v26 = vpop.f32.mrf.mxu1  ;;  %v245_v28 = vpop.f32.mrf.mxu2 }
  0xb5   :  { %v347_v27 = vmax.f32 %v331_v25, 0.0  ;;  %v295_v30 = vadd.f32 %v294_v18, %v245_v28 }
  0xb6   :  { %v227_v31 = vpop.f32.mrf.mxu0 }
  0xb7   :  { %v363_v32 = vpack.c.bf16 %v347_v27, %v347_v27  ;;  %v277_v33 = vadd.f32 %v276_v9, %v227_v31  ;;  %v321_v34 = vmul.f32 %v702_v3, %v295_v30 }
  0xb9   :  { %380 = vst.msk [vmem:[%s814_s3 + $0x8] sm:$0xf] %vm377_vm3, %v363_v32  ;;  %v314_v35 = vmul.f32 %v702_v3, %v277_v33  ;;  %v339_v36 = vadd.f32 %v707_v6, %v321_v34 }
  0xbb   :  { %v332_v37 = vadd.f32 %v707_v6, %v314_v35  ;;  %v355_v39 = vmax.f32 %v339_v36, 0.0 }
  0xbc   :  { %v284_v38 = vpop.f32.mrf.mxu1  ;;  %v247_v41 = vpop.f32.mrf.mxu2 }
  0xbd   :  { %v348_v40 = vmax.f32 %v332_v37, 0.0  ;;  %v371_v42 = vpack.c.bf16 %v355_v39, %v355_v39  ;;  %v297_v43 = vadd.f32 %v296_v29, %v247_v41 }
  0xbe   :  { %v230_v44 = vpop.f32.mrf.mxu0 }
  0xbf   :  { %v364_v45 = vpack.c.bf16 %v348_v40, %v348_v40  ;;  %v280_v47 = vadd.f32 %v279_v17, %v230_v44  ;;  %388 = vst.msk [vmem:[%s814_s3 + $0x28] sm:$0xf] %vm377_vm3, %v371_v42  ;;  %v322_v48 = vmul.f32 %v702_v3, %v297_v43  ;;  %v306_v42 = vpop.f32.mrf.mxu3 }
  0xc1   :  { %381 = vst.msk [vmem:[%s814_s3 + $0xc] sm:$0xf] %vm377_vm3, %v364_v45  ;;  %v315_v49 = vmul.f32 %v702_v3, %v280_v47  ;;  %v340_v50 = vadd.f32 %v707_v6, %v322_v48 }
  0xc3   :  { %v333_v51 = vadd.f32 %v707_v6, %v315_v49  ;;  %v356_v53 = vmax.f32 %v340_v50, 0.0 }
  0xc4   :  { %v286_v52 = vpop.f32.mrf.mxu1  ;;  %v250_v55 = vpop.f32.mrf.mxu2 }
  0xc5   :  { %v349_v54 = vmax.f32 %v333_v51, 0.0  ;;  %v372_v56 = vpack.c.bf16 %v356_v53, %v356_v53  ;;  %v300_v57 = vadd.f32 %v299_v46, %v250_v55 }
  0xc6   :  { %v232_v58 = vpop.f32.mrf.mxu0 }
  0xc7   :  { %v365_v59 = vpack.c.bf16 %v349_v54, %v349_v54  ;;  %v282_v60 = vadd.f32 %v281_v26, %v232_v58  ;;  %389 = vst.msk [vmem:[%s814_s3 + $0x2c] sm:$0xf] %vm377_vm3, %v372_v56  ;;  %v323_v61 = vmul.f32 %v702_v3, %v300_v57 }
  0xc9   :  { %382 = vst.msk [vmem:[%s814_s3 + $0x10] sm:$0xf] %vm377_vm3, %v365_v59  ;;  %v316_v63 = vmul.f32 %v702_v3, %v282_v60  ;;  %v341_v0 = vadd.f32 %v707_v6, %v323_v61 }
  0xcb   :  { %v334_v1 = vadd.f32 %v707_v6, %v316_v63  ;;  %v357_v4 = vmax.f32 %v341_v0, 0.0 }
  0xcc   :  { %v289_v2 = vpop.f32.mrf.mxu1  ;;  %v252_v8 = vpop.f32.mrf.mxu2 }
  0xcd   :  { %v290_v5 = vadd.f32 %v289_v2, %v711_v11  ;;  %v350_v7 = vmax.f32 %v334_v1, 0.0  ;;  %v373_v9 = vpack.c.bf16 %v357_v4, %v357_v4  ;;  %v302_v12 = vadd.f32 %v301_v62, %v252_v8 }
  0xce   :  { %v235_v13 = vpop.f32.mrf.mxu0 }
  0xcf   :  { %v319_v10 = vmul.f32 %v702_v3, %v290_v5  ;;  %v366_v14 = vpack.c.bf16 %v350_v7, %v350_v7  ;;  %v285_v15 = vadd.f32 %v284_v38, %v235_v13  ;;  %390 = vst.msk [vmem:[%s814_s3 + $0x30] sm:$0xf] %vm377_vm3, %v373_v9  ;;  %v324_v17 = vmul.f32 %v702_v3, %v302_v12 }
  0xd1   :  { %v337_v16 = vadd.f32 %v707_v6, %v319_v10  ;;  %383 = vst.msk [vmem:[%s814_s3 + $0x14] sm:$0xf] %vm377_vm3, %v366_v14  ;;  %v317_v11 = vmul.f32 %v702_v3, %v285_v15  ;;  %v342_v19 = vadd.f32 %v707_v6, %v324_v17 }
  0xd3   :  { %v353_v18 = vmax.f32 %v337_v16, 0.0  ;;  %v335_v22 = vadd.f32 %v707_v6, %v317_v11  ;;  %v358_v25 = vmax.f32 %v342_v19, 0.0 }
  0xd4   :  { %v291_v23 = vpop.f32.mrf.mxu1  ;;  %v255_v28 = vpop.f32.mrf.mxu2 }
  0xd5   :  { %v369_v24 = vpack.c.bf16 %v353_v18, %v353_v18  ;;  %v292_v26 = vadd.f32 %v291_v23, %v719_v20  ;;  %v351_v27 = vmax.f32 %v335_v22, 0.0  ;;  %v374_v29 = vpack.c.bf16 %v358_v25, %v358_v25 }
  0xd6   :  { %v305_v31 = vadd.f32 %v304_v21, %v255_v28  ;;  %v237_v32 = vpop.f32.mrf.mxu0 }
  0xd7   :  { %386 = vst.msk [vmem:[%s814_s3 + $0x20] sm:$0xf] %vm377_vm3, %v369_v24  ;;  %v320_v30 = vmul.f32 %v702_v3, %v292_v26  ;;  %v367_v33 = vpack.c.bf16 %v351_v27, %v351_v27  ;;  %v287_v34 = vadd.f32 %v286_v52, %v237_v32 }
  0xd8   :  { %391 = vst.msk [vmem:[%s814_s3 + $0x34] sm:$0xf] %vm377_vm3, %v374_v29  ;;  %v325_v35 = vmul.f32 %v702_v3, %v305_v31 }
  0xd9   :  { %v338_v20 = vadd.f32 %v707_v6, %v320_v30  ;;  %384 = vst.msk [vmem:[%s814_s3 + $0x18] sm:$0xf] %vm377_vm3, %v367_v33  ;;  %v318_v36 = vmul.f32 %v702_v3, %v287_v34 }
  0xda   :  { %v343_v38 = vadd.f32 %v707_v6, %v325_v35 }
  0xdb   :  { %v354_v37 = vmax.f32 %v338_v20, 0.0  ;;  %v336_v39 = vadd.f32 %v707_v6, %v318_v36 }
  0xdc   :  { %v359_v41 = vmax.f32 %v343_v38, 0.0  ;;  %v257_v44 = vpop.f32.mrf.mxu2 }
  0xdd   :  { %v370_v40 = vpack.c.bf16 %v354_v37, %v354_v37  ;;  %v352_v43 = vmax.f32 %v336_v39, 0.0  ;;  %v307_v46 = vadd.f32 %v306_v42, %v257_v44 }
  0xde   :  { %v375_v45 = vpack.c.bf16 %v359_v41, %v359_v41 }
  0xdf   :  { %387 = vst.msk [vmem:[%s814_s3 + $0x24] sm:$0xf] %vm377_vm3, %v370_v40  ;;  %v368_v47 = vpack.c.bf16 %v352_v43, %v352_v43  ;;  %v326_v48 = vmul.f32 %v702_v3, %v307_v46 }
  0xe0   :  { %392 = vst.msk [vmem:[%s814_s3 + $0x38] sm:$0xf] %vm377_vm3, %v375_v45 }
  0xe1   :  { %385 = vst.msk [vmem:[%s814_s3 + $0x1c] sm:$0xf] %vm377_vm3, %v368_v47  ;;  %v344_v49 = vadd.f32 %v707_v6, %v326_v48 }
  0xe3   :  { %v360_v50 = vmax.f32 %v344_v49, 0.0 }
  0xe5   :  { %v376_v51 = vpack.c.bf16 %v360_v50, %v360_v50 }
  0xe7   :  { %393 = vst.msk [vmem:[%s814_s3 + $0x3c] sm:$0xf] %vm377_vm3, %v376_v51 }

</bundles_post_ra>
